<compile_context>
chip_gen: v7x
topology: tpu7x:2x2x1
jax: 0.10.0
libtpu: 0.0.40
codegen_flags: <defaults>
</compile_context>

<pallas_src>
import jax
import jax.numpy as jnp
from jax.experimental import pallas as pl
from jax.experimental.pallas import tpu as pltpu


def _scalar_kernel(v_ref, o_ref):
    # Trivial SMEM scalar copy: o[0, 0] = v[0, 0].
    o_ref[0, 0] = v_ref[0, 0]


@jax.jit
def _scalar_forward_pallas(value_2d: jax.Array) -> jax.Array:
    """Takes the pre-shaped (1, 1) float32 parameter; returns it as (1, 1).

    Grid-less, SMEM-only pallas_call — the cheapest possible kernel boundary.
    Kept only for API parity; the fast path (ScalarPallas.__call__) bypasses
    it entirely.
    """
    return pl.pallas_call(
        _scalar_kernel,
        out_shape=jax.ShapeDtypeStruct((1, 1), jnp.float32),
        in_specs=[pl.BlockSpec(memory_space=pltpu.SMEM)],
        out_specs=pl.BlockSpec(memory_space=pltpu.SMEM),
    )(value_2d)


class ScalarPallas:
    """Mirrors the PyTorch `Scalar` module: holds one scalar parameter."""

    def __init__(self, init_value: float):
        # Parameter stored once as a 0-d float32 (matches torch.tensor(float)).
        self.value = jnp.asarray(init_value, dtype=jnp.float32)
        # Hoisted (1, 1) SMEM-friendly layout for the optional Pallas path.
        self._value_2d = self.value.reshape(1, 1)

    def __call__(self) -> jax.Array:
        # Fast path (per perf review): forward() is "return the parameter",
        # so no kernel launch — zero device work.
        return self.value

    def forward_pallas(self) -> jax.Array:
        # Optional kernel-boundary path for API parity / fusion template.
        out = _scalar_forward_pallas(self._value_2d)
        return out.reshape(())  # metadata-only reshape at the API boundary


if __name__ == "__main__":
    # Deterministic parameter "initialization" from PRNGKey(0).
    key = jax.random.PRNGKey(0)
    init_value = float(jax.random.normal(key, ()))

    module = ScalarPallas(init_value)

    # Fast path (what a real forward should use).
    out_fast = jax.block_until_ready(module())
    assert out_fast.shape == ()
    assert out_fast.dtype == jnp.float32
    assert jnp.allclose(out_fast, jnp.float32(init_value)), (out_fast, init_value)

    # Run the Pallas kernel once and verify it matches.
    out_kernel = jax.block_until_ready(module.forward_pallas())
    assert out_kernel.shape == ()
    assert out_kernel.dtype == jnp.float32
    assert jnp.allclose(out_kernel, jnp.float32(init_value)), (out_kernel, init_value)

    print("KERNEL_OK")
</pallas_src>

<mosaic_0001>
module attributes {stable_mosaic.version = 11 : i64} {
  func.func @_scalar_kernel(%arg0: memref<1x1xf32, #tpu.memory_space<smem>>, %arg1: memref<1x1xf32, #tpu.memory_space<smem>>) attributes {dimension_semantics = [], scalar_prefetch = 0 : i64, scratch_operands = 0 : i64, tpu.core_type = #tpu.core_type<tc>} {
    %c0 = arith.constant 0 : index
    %c0_0 = arith.constant 0 : index
    %0 = memref.load %arg0[%c0, %c0_0] : memref<1x1xf32, #tpu.memory_space<smem>>
    %c0_1 = arith.constant 0 : index
    %c0_2 = arith.constant 0 : index
    %1 = memref.load %arg1[%c0_1, %c0_2] : memref<1x1xf32, #tpu.memory_space<smem>>
    memref.store %0, %arg1[%c0_1, %c0_2] : memref<1x1xf32, #tpu.memory_space<smem>>
    return
  }
}

</mosaic_0001>

<bundles_post_ra>
// kernel: _scalar_forward_pallas.1
= control target key start
LH: loop header
LB: loop body
LE: loop exit
PB: predicated region body
PF: predicated region fallthrough
CT: control target
= control target key end

     0   :  { %7 = vsyncpa [#allocation4], 0  ;;  %s65_s0 = inlined_call_operand.<no memory space> [shape: f32[1,1], index: 0, kind: input, shape index: {}]   ;;  %s66_s1 = inlined_call_operand.hbm [shape: f32[1,1], index: 1, kind: output, shape index: {}]  }
   0x1   :  { %12 = sst [smem:[#allocation3]] %s65_s0  ;;  %s27_s10 = scalar_lea.hbm %s66_s1, 16 }
   0x2   :  { %p28_p0 = scmp.ne.s32.totalorder %s66_s1, %s27_s10  ;;  %p31_p1 = scmp.lt.u32.totalorder %s27_s10, %s66_s1 }
   0x4   :  { %p33_p2 = pnand %p31_p1, %p28_p0 }
   0x6   :  { %36 = shalt.err (!%p33_p2)
}
   0x7   :  { %s39_s15 = smov [#allocation3]  }
   0x8   :  { %20 = dma.smem_to_hbm %s39_s15, 16, %s66_s1, [#allocation4]  }
   0x9   :  { %37 = dma.done.wait [#allocation4], 16  }
   0xa   :  { %38 = vsyncadd [#allocation4], 4294967280 }
   0xb   :  { %24 = sfence }
   0xc   :  { %25 = vsyncpa [#allocation4], 1 }

</bundles_post_ra>
